<compile_context>
chip_gen: v5e
topology: v5e:2x2
jax: 0.10.0
libtpu: 0.0.40
codegen_flags: <defaults>
</compile_context>

<pallas_src>
import functools

import jax
import jax.numpy as jnp
from jax.experimental import pallas as pl
from jax.experimental.pallas import tpu as pltpu

ALPHA = 0.25
GAMMA = 2.0     # statically 2.0 -> (1 - pt)**2 implemented as a clamped square
MIB = 1024 * 1024


def _round_up(x: int, m: int) -> int:
    return ((x + m - 1) // m) * m


def _device_params():
    """Generation-aware (n_cores, vmem_limit_bytes, tile_budget_bytes)."""
    kind = ""
    try:
        kind = jax.devices()[0].device_kind.lower()
    except Exception:
        pass

    if ("v7" in kind) or ("tpu7" in kind):
        # v7x: 2 TensorCores, only 64 MiB VMEM per TC.
        n_cores, vmem_limit, tile_budget = 2, 48 * MIB, 40 * MIB
    else:
        # v5e / v6e (and unknown): single TensorCore, 128 MiB physical VMEM.
        n_cores, vmem_limit, tile_budget = 1, 80 * MIB, 64 * MIB

    # Belt-and-suspenders: never ask for more than ~3/4 of physical VMEM.
    try:
        info = pltpu.get_tpu_info()
        phys = getattr(info, "vmem_capacity_bytes", None)
        if phys:
            vmem_limit = min(vmem_limit, int(phys * 3) // 4)
            tile_budget = min(tile_budget, (vmem_limit * 5) // 6)
    except Exception:
        pass
    return n_cores, vmem_limit, tile_budget


def _focal_loss_kernel(logits_ref, targets_ref, out_ref, acc_ref, *,
                       n_total, tile_n, tiles_per_core, tiles_total, use_mxu):
    core = pl.program_id(0)
    i = pl.program_id(1)

    @pl.when(i == 0)
    def _():
        acc_ref[...] = jnp.zeros_like(acc_ref)

    g = core * tiles_per_core + i        # unclamped global tile index

    # Skip all compute for duplicated/clamped tail tiles (rows are fully masked).
    @pl.when(g < tiles_total)
    def _():
        x_in = logits_ref[...]                            # (tile_n, C), original dtype
        t = targets_ref[...]                              # (tile_n, 1) int32
        tn, c = x_in.shape

        x = x_in.astype(jnp.float32)                      # cast in VMEM

        # (1, C) class iota broadcast against (tile_n, 1) targets -> one-hot mask.
        col = jax.lax.broadcasted_iota(jnp.int32, (1, c), 1)
        onehot = col == t                                  # (tile_n, C) bool

        # Numerically stable logsumexp pieces.
        m = jnp.max(x, axis=-1, keepdims=True)             # XLU lane reduce
        p = jnp.exp(x - m)                                 # EUP

        if use_mxu:
            # bf16 inputs: move 2 of the 3 lane reductions to the idle MXU.
            ones_col = jnp.ones((c, 1), dtype=jnp.bfloat16)
            # Target-logit gather: one non-zero bf16 per row * 1.0 -> exact.
            masked = jnp.where(onehot, x_in, jnp.zeros_like(x_in))
            x_t = jnp.dot(masked, ones_col, preferred_element_type=jnp.float32)
            # exp-sum: hi/lo bf16 split keeps ~f32 accuracy (rel err ~2^-18).
            p_hi = p.astype(jnp.bfloat16)
            p_lo = (p - p_hi.astype(jnp.float32)).astype(jnp.bfloat16)
            s = (jnp.dot(p_hi, ones_col, preferred_element_type=jnp.float32)
                 + jnp.dot(p_lo, ones_col, preferred_element_type=jnp.float32))
        else:
            # f32 inputs: exact f32 XLU reductions (no MXU truncation).
            x_t = jnp.max(jnp.where(onehot, x, -jnp.inf), axis=-1, keepdims=True)
            s = jnp.sum(p, axis=-1, keepdims=True)

        lse = m + jnp.log(s)
        ce = lse - x_t                                      # per-sample cross entropy
        pt = jnp.exp(-ce)
        one_minus_pt = jnp.maximum(1.0 - pt, 0.0)           # clamp: no NaN if pt rounds > 1
        focal = ALPHA * one_minus_pt * one_minus_pt * ce    # gamma == 2 -> square

        # Mask rows past the true batch size (tile padding / duplicated last tile).
        row = jax.lax.broadcasted_iota(jnp.int32, (tn, 1), 0)
        valid = (g * tile_n + row) < n_total
        acc_ref[...] += jnp.sum(jnp.where(valid, focal, 0.0), keepdims=True)

    @pl.when(i == pl.num_programs(1) - 1)
    def _():
        out_ref[...] = acc_ref[...].reshape(1, 1, 1)        # per-core partial sum


def focal_loss(logits: jax.Array, targets: jax.Array) -> jax.Array:
    """logits: (N, C) float (f32 or bf16); targets: (N,) int. Returns scalar f32."""
    n, c = logits.shape
    targets2d = targets.astype(jnp.int32).reshape(n, 1)
    itemsize = jnp.dtype(logits.dtype).itemsize
    use_mxu = logits.dtype == jnp.bfloat16

    n_cores, vmem_limit, tile_budget = _device_params()

    # Byte-budgeted tile sizing (no hard row cap). Everything in VMEM is
    # lane-padded to 128, so per tile row we conservatively account for:
    #   2 x logits DMA buffers (input dtype, lane-padded)
    #   6 x (tile_n, cpad) f32 working arrays (cast / exp / masks / MXU splits)
    #  10 x (tile_n, 1) column temporaries (m, lse, ce, pt, focal, ... pad to 128)
    #   2 x (tile_n, 1) int32 targets DMA buffers (pad to 128 lanes)
    cpad = _round_up(c, 128)
    bytes_per_row = (2 * cpad * itemsize) + (6 * cpad * 4) + (12 * 512)
    tile_n = max(8, (tile_budget // bytes_per_row) // 8 * 8)
    tile_n = min(tile_n, _round_up(n, 8))      # never bigger than the batch

    tiles_total = pl.cdiv(n, tile_n)
    n_cores = max(1, min(n_cores, tiles_total))   # no all-idle core axis
    tiles_per_core = pl.cdiv(tiles_total, n_cores)

    def blk_idx(core, i):
        # Clamp so DMAs for the (possibly duplicated) last tile stay in bounds;
        # the kernel masks/skips duplicated rows via the *unclamped* index.
        return (jnp.minimum(core * tiles_per_core + i, tiles_total - 1), 0)

    kernel = functools.partial(
        _focal_loss_kernel, n_total=n, tile_n=tile_n,
        tiles_per_core=tiles_per_core, tiles_total=tiles_total, use_mxu=use_mxu)

    partials = pl.pallas_call(
        kernel,
        out_shape=jax.ShapeDtypeStruct((n_cores, 1, 1), jnp.float32),
        grid_spec=pltpu.PrefetchScalarGridSpec(
            num_scalar_prefetch=0,
            grid=(n_cores, tiles_per_core),
            in_specs=[
                pl.BlockSpec((tile_n, c), blk_idx),
                pl.BlockSpec((tile_n, 1), blk_idx),
            ],
            out_specs=pl.BlockSpec((1, 1, 1), lambda core, i: (core, 0, 0)),
            scratch_shapes=[pltpu.VMEM((1, 1), jnp.float32)],
        ),
        compiler_params=pltpu.CompilerParams(
            dimension_semantics=("parallel", "arbitrary"),
            vmem_limit_bytes=vmem_limit,
        ),
        cost_estimate=pl.CostEstimate(
            flops=8 * n * c,
            transcendentals=n * c + 2 * n,
            bytes_accessed=n * c * itemsize + n * 4 + n_cores * 4,
        ),
    )(logits, targets2d)

    return jnp.sum(partials) / jnp.float32(n)


def _focal_loss_ref(logits, targets):
    # Pure-JAX reference for verification.
    logits = logits.astype(jnp.float32)
    lse = jax.nn.logsumexp(logits, axis=-1)
    x_t = jnp.take_along_axis(logits, targets[:, None].astype(jnp.int32), axis=-1)[:, 0]
    ce = lse - x_t
    pt = jnp.exp(-ce)
    return jnp.mean(ALPHA * (1.0 - pt) ** GAMMA * ce)


if __name__ == "__main__":
    key = jax.random.PRNGKey(0)
    k1, k2 = jax.random.split(key)
    N, C = 8, 32  # batch of 8 samples, 32 classes
    logits_f32 = jax.random.normal(k1, (N, C), dtype=jnp.float32)
    targets = jax.random.randint(k2, (N,), 0, C, dtype=jnp.int32)

    # f32 path (exact XLU reductions).
    loss = focal_loss(logits_f32, targets)
    jax.block_until_ready(loss)
    ref = _focal_loss_ref(logits_f32, targets)
    assert jnp.allclose(loss, ref, rtol=1e-5, atol=1e-6), (loss, ref)

    # bf16 path (MXU gather + hi/lo-split MXU exp-sum; no wrapper up-cast pass over HBM).
    logits_bf16 = logits_f32.astype(jnp.bfloat16)
    loss_bf16 = focal_loss(logits_bf16, targets)
    jax.block_until_ready(loss_bf16)
    ref_bf16 = _focal_loss_ref(logits_bf16, targets)
    assert jnp.allclose(loss_bf16, ref_bf16, rtol=1e-4, atol=1e-5), (loss_bf16, ref_bf16)

    print("KERNEL_OK")
</pallas_src>

<mosaic_0001>
module attributes {stable_mosaic.version = 11 : i64} {
  func.func @_focal_loss_kernel(%arg0: i32, %arg1: i32, %arg2: memref<8x32xf32, #tpu.memory_space<vmem>>, %arg3: memref<8x1xi32, #tpu.memory_space<vmem>>, %arg4: memref<1x1x1xf32, #tpu.memory_space<vmem>>, %arg5: memref<1x1xf32, #tpu.memory_space<vmem>>) attributes {dimension_semantics = [#tpu.dimension_semantics<parallel>, #tpu.dimension_semantics<arbitrary>], iteration_bounds = array<i64: 1, 1>, scalar_prefetch = 0 : i64, scratch_operands = 1 : i64, tpu.core_type = #tpu.core_type<tc>, window_params = [{transform_indices = @transform_0, window_bounds = array<i64: 8, 32>}, {transform_indices = @transform_1, window_bounds = array<i64: 8, 1>}, {transform_indices = @transform_2, window_bounds = array<i64: 1, 1, 1>}]} {
    %c0_i32 = arith.constant 0 : i32
    %0 = arith.cmpi eq, %arg1, %c0_i32 : i32
    %1 = arith.extui %0 : i1 to i32
    %c0_i32_0 = arith.constant 0 : i32
    %2 = arith.cmpi ne, %1, %c0_i32_0 : i32
    scf.if %2 {
      %cst = arith.constant 0.000000e+00 : f32
      %11 = vector.broadcast %cst : f32 to vector<1x1xf32>
      %c0 = arith.constant 0 : index
      %c0_5 = arith.constant 0 : index
      %12 = vector.load %arg5[%c0, %c0_5] : memref<1x1xf32, #tpu.memory_space<vmem>>, vector<1x1xf32>
      tpu.vector_store %arg5[%c0, %c0_5], %11 {strides = array<i32>} : memref<1x1xf32, #tpu.memory_space<vmem>>, vector<1x1xf32>,
    } else {
    }
    %c1_i32 = arith.constant 1 : i32
    %3 = arith.muli %arg0, %c1_i32 : i32
    %4 = arith.addi %3, %arg1 : i32
    %c1_i32_1 = arith.constant 1 : i32
    %5 = arith.cmpi slt, %4, %c1_i32_1 : i32
    %6 = arith.extui %5 : i1 to i32
    %c0_i32_2 = arith.constant 0 : i32
    %7 = arith.cmpi ne, %6, %c0_i32_2 : i32
    scf.if %7 {
      %c0 = arith.constant 0 : index
      %c0_5 = arith.constant 0 : index
      %11 = vector.load %arg2[%c0, %c0_5] : memref<8x32xf32, #tpu.memory_space<vmem>>, vector<8x32xf32>
      %c0_6 = arith.constant 0 : index
      %c0_7 = arith.constant 0 : index
      %12 = vector.load %arg3[%c0_6, %c0_7] : memref<8x1xi32, #tpu.memory_space<vmem>>, vector<8x1xi32>
      %13 = tpu.iota {dimensions = array<i32: 1>} : vector<1x32xi32>
      %14 = vector.broadcast %13 : vector<1x32xi32> to vector<8x32xi32>
      %15 = vector.broadcast %12 : vector<8x1xi32> to vector<8x32xi32>
      %16 = arith.cmpi eq, %14, %15 : vector<8x32xi32>
      %cst = arith.constant dense<0xFF800000> : vector<8xf32>
      %17 = vector.multi_reduction <maximumf>, %11, %cst [1] : vector<8x32xf32> to vector<8xf32>
      %18 = vector.shape_cast %17 : vector<8xf32> to vector<8x1xf32>
      %19 = vector.broadcast %18 : vector<8x1xf32> to vector<8x32xf32>
      %20 = arith.subf %11, %19 : vector<8x32xf32>
      %21 = math.exp %20 : vector<8x32xf32>
      %cst_8 = arith.constant 0xFF800000 : f32
      %22 = vector.broadcast %cst_8 : f32 to vector<8x32xf32>
      %23 = arith.select %16, %11, %22 : vector<8x32xi1>, vector<8x32xf32>
      %cst_9 = arith.constant dense<0xFF800000> : vector<8xf32>
      %24 = vector.multi_reduction <maximumf>, %23, %cst_9 [1] : vector<8x32xf32> to vector<8xf32>
      %25 = vector.shape_cast %24 : vector<8xf32> to vector<8x1xf32>
      %cst_10 = arith.constant dense<0.000000e+00> : vector<8xf32>
      %26 = vector.multi_reduction <add>, %21, %cst_10 [1] : vector<8x32xf32> to vector<8xf32>
      %27 = vector.shape_cast %26 : vector<8xf32> to vector<8x1xf32>
      %28 = math.log %27 : vector<8x1xf32>
      %29 = arith.addf %18, %28 : vector<8x1xf32>
      %30 = arith.subf %29, %25 : vector<8x1xf32>
      %cst_11 = arith.constant 0.000000e+00 : f32
      %31 = vector.broadcast %cst_11 : f32 to vector<8x1xf32>
      %32 = arith.subf %31, %30 : vector<8x1xf32>
      %33 = math.exp %32 : vector<8x1xf32>
      %cst_12 = arith.constant 1.000000e+00 : f32
      %34 = vector.broadcast %cst_12 : f32 to vector<8x1xf32>
      %35 = arith.subf %34, %33 : vector<8x1xf32>
      %cst_13 = arith.constant 0.000000e+00 : f32
      %36 = vector.broadcast %cst_13 : f32 to vector<8x1xf32>
      %37 = arith.maximumf %35, %36 : vector<8x1xf32>
      %cst_14 = arith.constant 2.500000e-01 : f32
      %38 = vector.broadcast %cst_14 : f32 to vector<8x1xf32>
      %39 = arith.mulf %38, %37 : vector<8x1xf32>
      %40 = arith.mulf %39, %37 : vector<8x1xf32>
      %41 = arith.mulf %40, %30 : vector<8x1xf32>
      %42 = tpu.iota {dimensions = array<i32: 0>} : vector<8x1xi32>
      %c8_i32 = arith.constant 8 : i32
      %43 = arith.muli %4, %c8_i32 : i32
      %44 = vector.broadcast %43 : i32 to vector<8x1xi32>
      %45 = arith.addi %44, %42 : vector<8x1xi32>
      %c8_i32_15 = arith.constant 8 : i32
      %46 = vector.broadcast %c8_i32_15 : i32 to vector<8x1xi32>
      %47 = arith.cmpi slt, %45, %46 : vector<8x1xi32>
      %c0_16 = arith.constant 0 : index
      %c0_17 = arith.constant 0 : index
      %48 = vector.load %arg5[%c0_16, %c0_17] : memref<1x1xf32, #tpu.memory_space<vmem>>, vector<1x1xf32>
      %cst_18 = arith.constant 0.000000e+00 : f32
      %49 = vector.broadcast %cst_18 : f32 to vector<8x1xf32>
      %50 = arith.select %47, %41, %49 : vector<8x1xi1>, vector<8x1xf32>
      %51 = vector.shape_cast %50 : vector<8x1xf32> to vector<1x8x1xf32>
      %cst_19 = arith.constant dense<0.000000e+00> : vector<1xf32>
      %52 = vector.multi_reduction <add>, %51, %cst_19 [1, 2] : vector<1x8x1xf32> to vector<1xf32>
      %53 = vector.shape_cast %52 : vector<1xf32> to vector<1x1x1xf32>
      %54 = vector.extract %53[0, 0, 0] : f32 from vector<1x1x1xf32>
      %55 = vector.broadcast %54 : f32 to vector<1x1xf32>
      %56 = arith.addf %48, %55 : vector<1x1xf32>
      %c0_20 = arith.constant 0 : index
      %c0_21 = arith.constant 0 : index
      %57 = vector.load %arg5[%c0_20, %c0_21] : memref<1x1xf32, #tpu.memory_space<vmem>>, vector<1x1xf32>
      tpu.vector_store %arg5[%c0_20, %c0_21], %56 {strides = array<i32>} : memref<1x1xf32, #tpu.memory_space<vmem>>, vector<1x1xf32>,
    } else {
    }
    %c0_i32_3 = arith.constant 0 : i32
    %8 = arith.cmpi eq, %arg1, %c0_i32_3 : i32
    %9 = arith.extui %8 : i1 to i32
    %c0_i32_4 = arith.constant 0 : i32
    %10 = arith.cmpi ne, %9, %c0_i32_4 : i32
    scf.if %10 {
      %c0 = arith.constant 0 : index
      %c0_5 = arith.constant 0 : index
      %11 = vector.load %arg5[%c0, %c0_5] : memref<1x1xf32, #tpu.memory_space<vmem>>, vector<1x1xf32>
      %12 = vector.shape_cast %11 : vector<1x1xf32> to vector<1x1x1xf32>
      %c0_6 = arith.constant 0 : index
      %c0_7 = arith.constant 0 : index
      %c0_8 = arith.constant 0 : index
      %13 = vector.load %arg4[%c0_6, %c0_7, %c0_8] : memref<1x1x1xf32, #tpu.memory_space<vmem>>, vector<1x1x1xf32>
      tpu.vector_store %arg4[%c0_6, %c0_7, %c0_8], %12 {strides = array<i32>} : memref<1x1x1xf32, #tpu.memory_space<vmem>>, vector<1x1x1xf32>,
    } else {
    }
    return
  }
  func.func @transform_0(%arg0: i32, %arg1: i32) -> (i32, i32) {
    %c1_i32 = arith.constant 1 : i32
    %0 = arith.muli %arg0, %c1_i32 : i32
    %1 = arith.addi %0, %arg1 : i32
    %c0_i32 = arith.constant 0 : i32
    %2 = arith.minsi %1, %c0_i32 : i32
    %c0_i32_0 = arith.constant 0 : i32
    %c0_i32_1 = arith.constant 0 : i32
    return %2, %c0_i32_0 : i32, i32
  }
  func.func @transform_1(%arg0: i32, %arg1: i32) -> (i32, i32) {
    %c1_i32 = arith.constant 1 : i32
    %0 = arith.muli %arg0, %c1_i32 : i32
    %1 = arith.addi %0, %arg1 : i32
    %c0_i32 = arith.constant 0 : i32
    %2 = arith.minsi %1, %c0_i32 : i32
    %c0_i32_0 = arith.constant 0 : i32
    %c0_i32_1 = arith.constant 0 : i32
    return %2, %c0_i32_0 : i32, i32
  }
  func.func @transform_2(%arg0: i32, %arg1: i32) -> (i32, i32, i32) {
    %c0_i32 = arith.constant 0 : i32
    %c0_i32_0 = arith.constant 0 : i32
    %c0_i32_1 = arith.constant 0 : i32
    return %arg0, %c0_i32, %c0_i32_0 : i32, i32, i32
  }
}

</mosaic_0001>

<bundles_post_ra>
// kernel: tpu_custom_call.1
= control target key start
LH: loop header
LB: loop body
LE: loop exit
PB: predicated region body
PF: predicated region fallthrough
CT: control target
= control target key end

     0   :  { %vm85_vm0 = vcmask 261120   ;;  %s239_s0 = inlined_call_operand.vmem [shape: f32[8,32], index: 0, kind: input, shape index: {}]   ;;  %s240_s1 = inlined_call_operand.vmem [shape: s32[8,1], index: 1, kind: input, shape index: {}]   ;;  %s241_s2 = inlined_call_operand.hbm [shape: f32[1,1,1], index: 2, kind: output, shape index: {}]  }
   0x1   :  { %v77_v0 = vld [vmem:[%s239_s0] sm:$0xff] }
   0x2   :  { %7 = vsyncpa [#allocation4], 0  ;;  %v86_v1 = vsel %vm85_vm0, %v77_v0, -inf  ;;  %v206_v2 = vmov 0   ;;  %v78_v3 = vld [vmem:[%s240_s1] sm:$0xff]  ;;  %v79_v9 = vlaneseq  ;;  %vm119_vm2 = vcmask 7168  }
   0x3   :  { %173 = vset.pattern.permute.xlu0 %v206_v2  ;;  %vm70_vm3 = vcmask 0   ;;  %v207_v29 = vmov 0.0   ;;  %s208_s1 = smov [#allocation3]   ;;  %s147_s16 = sshll.u32 %s241_s2, 4  ;;  %s148_s16 = int_to_ptr.hbm [resolvable:$true] %s147_s16 }
   0x4   :  { %87 = vmax.xlane.f32.xlu0 %v86_v1  ;;  %v80_v10 = vand.u32 127, %v79_v9  ;;  %71 = vst.msk [vmem:[#allocation2] sm:$0x1] %vm70_vm3, %v207_v29  ;;  %s145_s13 = sshll.u32 %s208_s1, 4  ;;  %s146_s13 = int_to_ptr.vmem [resolvable:$true] %s145_s13 }
   0xb   :  { %v117_v37 = vld [vmem:[#allocation2] sm:$0x1] }
  0x18   :  { %82 = vperm.xlu0 %173, %v78_v3  }
  0x77   :  { %v88_v4 = vpop.xlane.xlu0 %87 }
  0x78   :  { %v89_v5 = vsub.f32 %v77_v0, %v88_v4 }
  0x7a   :  { %v90_v6 = vmul.f32 1.442695, %v89_v5 }
  0x7c   :  { %174 = vpow2.f32 %v90_v6 }
  0x82   :  { %v175_v7 = vpop.eup %174 }
  0x83   :  { %v96_v8 = vsel %vm85_vm0, %v175_v7, 0.0 }
  0x84   :  { %97 = vadd.xlane.f32.xlu1 %v96_v8 }
  0x8a   :  { %v83_v11 = vpop.permute.xlu0 %82 }
  0x8b   :  { %vm84_vm1 = vcmp.eq.s32.totalorder %v80_v10, %v83_v11 }
  0x8c   :  { %v92_v12 = vsel %vm84_vm1, %v77_v0, -inf }
  0x8d   :  { %v93_v13 = vsel %vm85_vm0, %v92_v12, -inf }
  0x8e   :  { %94 = vmax.xlane.f32.xlu1 %v93_v13 }
  0xf7   :  { %v98_v14 = vpop.xlane.xlu1 %97 }
  0xf8   :  { %176 = vlog2.f32 %v98_v14 }
  0xfe   :  { %v177_v15 = vpop.eup %176 }
  0xff   :  { %v100_v16 = vmul.f32 0.6931472, %v177_v15 }
 0x101   :  { %v101_v17 = vadd.f32 %v100_v16, %v88_v4  ;;  %v95_v18 = vpop.xlane.xlu1 %94 }
 0x103   :  { %v102_v19 = vsub.f32 %v101_v17, %v95_v18 }
 0x105   :  { %v103_v20 = vsub.f32 0.0, %v102_v19 }
 0x107   :  { %v104_v21 = vmul.f32 1.442695, %v103_v20 }
 0x109   :  { %178 = vpow2.f32 %v104_v21 }
 0x10f   :  { %v179_v22 = vpop.eup %178 }
 0x110   :  { %v106_v23 = vsub.f32 1.0, %v179_v22 }
 0x112   :  { %v107_v24 = vmax.f32 %v106_v23, 0.0 }
 0x114   :  { %v108_v25 = vmul.f32 0.25, %v107_v24 }
 0x116   :  { %v109_v26 = vmul.f32 %v108_v25, %v107_v24 }
 0x118   :  { %v110_v27 = vmul.f32 %v109_v26, %v102_v19 }
 0x11a   :  { %v120_v28 = vsel %vm119_vm2, %v110_v27, 0.0 }
 0x11b   :  { %121 = vadd.xlane.f32.xlu2 %v120_v28 }
 0x18e   :  { %v122_v30 = vpop.xlane.xlu2 %121 }
 0x18f   :  { %v123_v31 = vrot.slane %v122_v30, 4 }
 0x191   :  { %v124_v32 = vadd.f32 %v123_v31, %v122_v30 }
 0x193   :  { %v125_v33 = vrot.slane %v124_v32, 2 }
 0x195   :  { %v126_v34 = vadd.f32 %v125_v33, %v124_v32 }
 0x197   :  { %v127_v35 = vrot.slane %v126_v34, 1 }
 0x199   :  { %v128_v36 = vadd.f32 %v127_v35, %v126_v34 }
 0x19b   :  { %168 = vpush %v128_v36 }
 0x1cc   :  { %s169_s0 = spop %168 }
 0x1cd   :  { %v130_v38 = vstv %s169_s0 }
 0x1ce   :  { %v131_v39 = vadd.f32 %v130_v38, %v117_v37 }
 0x1d0   :  { %133 = vst.msk [vmem:[#allocation2] sm:$0x1] %vm70_vm3, %v131_v39 }
 0x1d7   :  { %v137_v40 = vld [vmem:[#allocation2] sm:$0x1] }
 0x1d8   :  { %139 = vst.msk [vmem:[#allocation3] sm:$0x1] %vm70_vm3, %v137_v40 }
 0x1d9   :  { %150 = dma.vmem_to_hbm [thread:$0]  %s146_s13, 16, %s148_s16, [#allocation4]  }
 0x1da   :  { %204 = dma.done.wait [#allocation4], 16  }
 0x1db   :  { %205 = vsyncadd [#allocation4], 4294967280 }
 0x1dc   :  { %155 = vsyncpa [#allocation4], 1 }

</bundles_post_ra>
